<compile_context>
chip_gen: v5e
topology: v5e:2x2
jax: 0.10.0
libtpu: 0.0.40
codegen_flags: <defaults>
</compile_context>

<pallas_src>
import jax
import jax.numpy as jnp
from jax.experimental import pallas as pl
from jax.experimental.pallas import tpu as pltpu

LANE = 128
OUT_PAD = 8            # final-layer padded width (real output is column 0)
MAX_TILE_B = 4096      # large tiles amortize per-step overhead; ~11 MiB VMEM at 4096
VMEM_LIMIT_BYTES = 48 * 1024 * 1024


def _round_up(x, m):
    return ((x + m - 1) // m) * m


def _choose_tile_b(B, max_tile_b):
    """Batch tile: sublane-aligned; >=2 grid steps for mid/large B (v7x megacore)."""
    if B <= 256:
        # Single step; too small to split usefully across TensorCores.
        return _round_up(B, 8)
    # At least 2 grid steps so the "parallel" batch axis can shard across
    # v7x's two TensorCores; multiple of 256 for MXU friendliness.
    return min(max_tile_b, _round_up(pl.cdiv(B, 2), 256))


def mlp_kernel(x_ref,
               w1_ref, b1_ref,
               w2_ref, b2_ref,
               w3_ref, b3_ref,
               w4_ref, b4_ref,
               w5_ref, b5_ref,
               o_ref):
    # x arrives f32 (tile_b, 32); cast to bf16 in-kernel (VPU op, hidden under
    # MXU time).  Weights are pre-padded bf16; accumulate + bias/ReLU/sigmoid
    # in f32 (v5e-safe: no bf16 VPU/EUP there).
    x = x_ref[...].astype(jnp.bfloat16)

    h = jnp.dot(x, w1_ref[...], preferred_element_type=jnp.float32) + b1_ref[...]
    h = jnp.maximum(h, 0.0)
    # TODO(synk): dropout is identity at inference; training-mode dropout would
    # use pltpu.prng_seed/prng_random_bits for the Bernoulli mask.

    h = jnp.dot(h.astype(jnp.bfloat16), w2_ref[...],
                preferred_element_type=jnp.float32) + b2_ref[...]
    h = jnp.maximum(h, 0.0)

    h = jnp.dot(h.astype(jnp.bfloat16), w3_ref[...],
                preferred_element_type=jnp.float32) + b3_ref[...]
    h = jnp.maximum(h, 0.0)

    h = jnp.dot(h.astype(jnp.bfloat16), w4_ref[...],
                preferred_element_type=jnp.float32) + b4_ref[...]
    h = jnp.maximum(h, 0.0)

    logits = jnp.dot(h.astype(jnp.bfloat16), w5_ref[...],
                     preferred_element_type=jnp.float32) + b5_ref[...]
    # Columns 1..7 are zero weight/bias -> sigmoid(0)=0.5; sliced in wrapper.
    o_ref[...] = jax.nn.sigmoid(logits).astype(o_ref.dtype)


def prepare_params(params, d_in):
    """One-time prep: pad hidden widths to 128 lanes (final layer to OUT_PAD=8)
    and cast weights to bf16.  Returns a flat tuple (w1,b1,...,w5,b5)."""
    flat = []
    cur_in = d_in
    last = len(params) - 1
    for li, (w, b) in enumerate(params):
        fi, fo = w.shape
        fo_p = OUT_PAD if li == last else _round_up(fo, LANE)
        w_p = jnp.zeros((cur_in, fo_p), jnp.bfloat16)
        w_p = w_p.at[:fi, :fo].set(w.astype(jnp.bfloat16))
        b_p = jnp.zeros((1, fo_p), jnp.float32)
        b_p = b_p.at[:, :fo].set(b.astype(jnp.float32))
        flat.extend([w_p, b_p])
        cur_in = fo_p
    return tuple(flat)


def advanced_nn_forward(x, flat_params, *, max_tile_b=MAX_TILE_B):
    """x: [B, d_in] f32; flat_params: output of prepare_params()."""
    B, d_in = x.shape

    tile_b = _choose_tile_b(B, max_tile_b)
    b_pad = _round_up(B, tile_b)
    # Only the batch dim is (sometimes) padded; feature dim stays at d_in.
    x_in = x if b_pad == B else jnp.pad(x, ((0, b_pad - B), (0, 0)))

    out_p = flat_params[-1].shape[-1]   # OUT_PAD (8)
    grid = (b_pad // tile_b,)

    # x: (tile_b, d_in) is legal because the last block dim equals the full
    # array dim (d_in=32 < 128 is fine under that rule).
    in_specs = [pl.BlockSpec((tile_b, d_in), lambda i: (i, 0))]
    for t in flat_params:
        # Constant block index -> weights/biases stay VMEM-resident across the
        # batch grid (Pallas skips the re-DMA when the block index repeats).
        in_specs.append(pl.BlockSpec(t.shape, lambda i: (0, 0)))

    out = pl.pallas_call(
        mlp_kernel,
        out_shape=jax.ShapeDtypeStruct((b_pad, out_p), jnp.float32),
        grid=grid,
        in_specs=in_specs,
        out_specs=pl.BlockSpec((tile_b, out_p), lambda i: (i, 0)),
        compiler_params=pltpu.CompilerParams(
            dimension_semantics=("parallel",),
            vmem_limit_bytes=VMEM_LIMIT_BYTES),
    )(x_in, *flat_params)

    return out[:B, :1]


def init_params(key, input_size, hidden_sizes=(256, 128, 64, 32)):
    """Deterministic PyTorch-style uniform(-1/sqrt(fan_in), 1/sqrt(fan_in)) init."""
    dims = [input_size, *hidden_sizes, 1]
    params = []
    for i in range(len(dims) - 1):
        fan_in, fan_out = dims[i], dims[i + 1]
        key, kw, kb = jax.random.split(key, 3)
        bound = 1.0 / jnp.sqrt(jnp.float32(fan_in))
        w = jax.random.uniform(kw, (fan_in, fan_out), jnp.float32, -bound, bound)
        b = jax.random.uniform(kb, (1, fan_out), jnp.float32, -bound, bound)
        params.append((w, b))
    return params


def reference_forward_bf16(x, params):
    """Pure-JAX reference mirroring the kernel's bf16 operands / f32 accumulate."""
    h = x
    for i, (w, b) in enumerate(params):
        h = jnp.dot(h.astype(jnp.bfloat16), w.astype(jnp.bfloat16),
                    preferred_element_type=jnp.float32) + b
        if i < len(params) - 1:
            h = jnp.maximum(h, 0.0)
        else:
            h = jax.nn.sigmoid(h)
    return h


def reference_forward_f32(x, params):
    """Full-precision reference matching the original PyTorch module."""
    h = x
    for i, (w, b) in enumerate(params):
        h = h @ w + b
        if i < len(params) - 1:
            h = jnp.maximum(h, 0.0)
        else:
            h = jax.nn.sigmoid(h)
    return h


if __name__ == "__main__":
    key = jax.random.PRNGKey(0)
    key, kx = jax.random.split(key)

    batch, input_size = 8, 32
    x = jax.random.normal(kx, (batch, input_size), jnp.float32)
    params = init_params(key, input_size)
    flat_params = prepare_params(params, input_size)   # one-time param prep

    out = advanced_nn_forward(x, flat_params)
    out = jax.block_until_ready(out)

    ref_bf16 = reference_forward_bf16(x, params)
    ref_f32 = reference_forward_f32(x, params)
    assert out.shape == (batch, 1), out.shape
    assert jnp.allclose(out, ref_bf16, atol=2e-3, rtol=2e-3), (
        f"bf16-ref mismatch: max abs err {jnp.max(jnp.abs(out - ref_bf16))}"
    )
    assert jnp.allclose(out, ref_f32, atol=5e-2, rtol=5e-2), (
        f"f32-ref mismatch: max abs err {jnp.max(jnp.abs(out - ref_f32))}"
    )

    # Exercise the multi-tile batch grid (>=2 programs, resident weights).
    key, kx2 = jax.random.split(key)
    x_big = jax.random.normal(kx2, (2048, input_size), jnp.float32)
    out_big = jax.block_until_ready(advanced_nn_forward(x_big, flat_params))
    ref_big = reference_forward_bf16(x_big, params)
    assert out_big.shape == (2048, 1), out_big.shape
    assert jnp.allclose(out_big, ref_big, atol=2e-3, rtol=2e-3), (
        f"grid mismatch: max abs err {jnp.max(jnp.abs(out_big - ref_big))}"
    )

    print("KERNEL_OK")
</pallas_src>

<mosaic_0001>
module attributes {stable_mosaic.version = 11 : i64} {
  func.func @mlp_kernel(%arg0: i32, %arg1: memref<8x32xf32, #tpu.memory_space<vmem>>, %arg2: memref<32x256xbf16, #tpu.memory_space<vmem>>, %arg3: memref<1x256xf32, #tpu.memory_space<vmem>>, %arg4: memref<256x128xbf16, #tpu.memory_space<vmem>>, %arg5: memref<1x128xf32, #tpu.memory_space<vmem>>, %arg6: memref<128x128xbf16, #tpu.memory_space<vmem>>, %arg7: memref<1x128xf32, #tpu.memory_space<vmem>>, %arg8: memref<128x128xbf16, #tpu.memory_space<vmem>>, %arg9: memref<1x128xf32, #tpu.memory_space<vmem>>, %arg10: memref<128x8xbf16, #tpu.memory_space<vmem>>, %arg11: memref<1x8xf32, #tpu.memory_space<vmem>>, %arg12: memref<8x8xf32, #tpu.memory_space<vmem>>) attributes {dimension_semantics = [#tpu.dimension_semantics<parallel>], iteration_bounds = array<i64: 1>, scalar_prefetch = 0 : i64, scratch_operands = 0 : i64, tpu.core_type = #tpu.core_type<tc>, window_params = [{transform_indices = @transform_0, window_bounds = array<i64: 8, 32>}, {pipeline_mode = #tpu.pipeline_mode<synchronous>, transform_indices = @transform_1, window_bounds = array<i64: 32, 256>}, {pipeline_mode = #tpu.pipeline_mode<synchronous>, transform_indices = @transform_2, window_bounds = array<i64: 1, 256>}, {pipeline_mode = #tpu.pipeline_mode<synchronous>, transform_indices = @transform_3, window_bounds = array<i64: 256, 128>}, {pipeline_mode = #tpu.pipeline_mode<synchronous>, transform_indices = @transform_4, window_bounds = array<i64: 1, 128>}, {pipeline_mode = #tpu.pipeline_mode<synchronous>, transform_indices = @transform_5, window_bounds = array<i64: 128, 128>}, {pipeline_mode = #tpu.pipeline_mode<synchronous>, transform_indices = @transform_6, window_bounds = array<i64: 1, 128>}, {pipeline_mode = #tpu.pipeline_mode<synchronous>, transform_indices = @transform_7, window_bounds = array<i64: 128, 128>}, {pipeline_mode = #tpu.pipeline_mode<synchronous>, transform_indices = @transform_8, window_bounds = array<i64: 1, 128>}, {pipeline_mode = #tpu.pipeline_mode<synchronous>, transform_indices = @transform_9, window_bounds = array<i64: 128, 8>}, {pipeline_mode = #tpu.pipeline_mode<synchronous>, transform_indices = @transform_10, window_bounds = array<i64: 1, 8>}, {transform_indices = @transform_11, window_bounds = array<i64: 8, 8>}]} {
    %c0 = arith.constant 0 : index
    %c0_0 = arith.constant 0 : index
    %0 = vector.load %arg1[%c0, %c0_0] : memref<8x32xf32, #tpu.memory_space<vmem>>, vector<8x32xf32>
    %1 = arith.truncf %0 : vector<8x32xf32> to vector<8x32xbf16>
    %c0_1 = arith.constant 0 : index
    %c0_2 = arith.constant 0 : index
    %2 = vector.load %arg2[%c0_1, %c0_2] : memref<32x256xbf16, #tpu.memory_space<vmem>>, vector<32x256xbf16>
    %cst = arith.constant dense<0.000000e+00> : vector<8x256xf32>
    %3 = tpu.matmul %1, %2, %cst {dimension_numbers = #tpu.dot_dimension_numbers<[1], [0], [0], [1], [0, 0, 1, 1], [], []>} : vector<8x32xbf16>, vector<32x256xbf16>, vector<8x256xf32> -> vector<8x256xf32>
    %c0_3 = arith.constant 0 : index
    %c0_4 = arith.constant 0 : index
    %4 = vector.load %arg3[%c0_3, %c0_4] : memref<1x256xf32, #tpu.memory_space<vmem>>, vector<1x256xf32>
    %5 = vector.broadcast %4 : vector<1x256xf32> to vector<8x256xf32>
    %6 = arith.addf %3, %5 : vector<8x256xf32>
    %cst_5 = arith.constant 0.000000e+00 : f32
    %7 = vector.broadcast %cst_5 : f32 to vector<8x256xf32>
    %8 = arith.maximumf %6, %7 : vector<8x256xf32>
    %9 = arith.truncf %8 : vector<8x256xf32> to vector<8x256xbf16>
    %c0_6 = arith.constant 0 : index
    %c0_7 = arith.constant 0 : index
    %10 = vector.load %arg4[%c0_6, %c0_7] : memref<256x128xbf16, #tpu.memory_space<vmem>>, vector<256x128xbf16>
    %cst_8 = arith.constant dense<0.000000e+00> : vector<8x128xf32>
    %11 = tpu.matmul %9, %10, %cst_8 {dimension_numbers = #tpu.dot_dimension_numbers<[1], [0], [0], [1], [0, 0, 1, 1], [], []>} : vector<8x256xbf16>, vector<256x128xbf16>, vector<8x128xf32> -> vector<8x128xf32>
    %c0_9 = arith.constant 0 : index
    %c0_10 = arith.constant 0 : index
    %12 = vector.load %arg5[%c0_9, %c0_10] : memref<1x128xf32, #tpu.memory_space<vmem>>, vector<1x128xf32>
    %13 = vector.broadcast %12 : vector<1x128xf32> to vector<8x128xf32>
    %14 = arith.addf %11, %13 : vector<8x128xf32>
    %cst_11 = arith.constant 0.000000e+00 : f32
    %15 = vector.broadcast %cst_11 : f32 to vector<8x128xf32>
    %16 = arith.maximumf %14, %15 : vector<8x128xf32>
    %17 = arith.truncf %16 : vector<8x128xf32> to vector<8x128xbf16>
    %c0_12 = arith.constant 0 : index
    %c0_13 = arith.constant 0 : index
    %18 = vector.load %arg6[%c0_12, %c0_13] : memref<128x128xbf16, #tpu.memory_space<vmem>>, vector<128x128xbf16>
    %cst_14 = arith.constant dense<0.000000e+00> : vector<8x128xf32>
    %19 = tpu.matmul %17, %18, %cst_14 {dimension_numbers = #tpu.dot_dimension_numbers<[1], [0], [0], [1], [0, 0, 1, 1], [], []>} : vector<8x128xbf16>, vector<128x128xbf16>, vector<8x128xf32> -> vector<8x128xf32>
    %c0_15 = arith.constant 0 : index
    %c0_16 = arith.constant 0 : index
    %20 = vector.load %arg7[%c0_15, %c0_16] : memref<1x128xf32, #tpu.memory_space<vmem>>, vector<1x128xf32>
    %21 = vector.broadcast %20 : vector<1x128xf32> to vector<8x128xf32>
    %22 = arith.addf %19, %21 : vector<8x128xf32>
    %cst_17 = arith.constant 0.000000e+00 : f32
    %23 = vector.broadcast %cst_17 : f32 to vector<8x128xf32>
    %24 = arith.maximumf %22, %23 : vector<8x128xf32>
    %25 = arith.truncf %24 : vector<8x128xf32> to vector<8x128xbf16>
    %c0_18 = arith.constant 0 : index
    %c0_19 = arith.constant 0 : index
    %26 = vector.load %arg8[%c0_18, %c0_19] : memref<128x128xbf16, #tpu.memory_space<vmem>>, vector<128x128xbf16>
    %cst_20 = arith.constant dense<0.000000e+00> : vector<8x128xf32>
    %27 = tpu.matmul %25, %26, %cst_20 {dimension_numbers = #tpu.dot_dimension_numbers<[1], [0], [0], [1], [0, 0, 1, 1], [], []>} : vector<8x128xbf16>, vector<128x128xbf16>, vector<8x128xf32> -> vector<8x128xf32>
    %c0_21 = arith.constant 0 : index
    %c0_22 = arith.constant 0 : index
    %28 = vector.load %arg9[%c0_21, %c0_22] : memref<1x128xf32, #tpu.memory_space<vmem>>, vector<1x128xf32>
    %29 = vector.broadcast %28 : vector<1x128xf32> to vector<8x128xf32>
    %30 = arith.addf %27, %29 : vector<8x128xf32>
    %cst_23 = arith.constant 0.000000e+00 : f32
    %31 = vector.broadcast %cst_23 : f32 to vector<8x128xf32>
    %32 = arith.maximumf %30, %31 : vector<8x128xf32>
    %33 = arith.truncf %32 : vector<8x128xf32> to vector<8x128xbf16>
    %c0_24 = arith.constant 0 : index
    %c0_25 = arith.constant 0 : index
    %34 = vector.load %arg10[%c0_24, %c0_25] : memref<128x8xbf16, #tpu.memory_space<vmem>>, vector<128x8xbf16>
    %cst_26 = arith.constant dense<0.000000e+00> : vector<8x8xf32>
    %35 = tpu.matmul %33, %34, %cst_26 {dimension_numbers = #tpu.dot_dimension_numbers<[1], [0], [0], [1], [0, 0, 1, 1], [], []>} : vector<8x128xbf16>, vector<128x8xbf16>, vector<8x8xf32> -> vector<8x8xf32>
    %c0_27 = arith.constant 0 : index
    %c0_28 = arith.constant 0 : index
    %36 = vector.load %arg11[%c0_27, %c0_28] : memref<1x8xf32, #tpu.memory_space<vmem>>, vector<1x8xf32>
    %37 = vector.broadcast %36 : vector<1x8xf32> to vector<8x8xf32>
    %38 = arith.addf %35, %37 : vector<8x8xf32>
    %39 = arith.negf %38 : vector<8x8xf32>
    %40 = math.exp %39 : vector<8x8xf32>
    %cst_29 = arith.constant 1.000000e+00 : f32
    %41 = vector.broadcast %cst_29 : f32 to vector<8x8xf32>
    %42 = arith.addf %41, %40 : vector<8x8xf32>
    %43 = arith.divf %41, %42 : vector<8x8xf32>
    %c0_30 = arith.constant 0 : index
    %c0_31 = arith.constant 0 : index
    %44 = vector.load %arg12[%c0_30, %c0_31] : memref<8x8xf32, #tpu.memory_space<vmem>>, vector<8x8xf32>
    tpu.vector_store %arg12[%c0_30, %c0_31], %43 {strides = array<i32>} : memref<8x8xf32, #tpu.memory_space<vmem>>, vector<8x8xf32>,
    return
  }
  func.func @transform_0(%arg0: i32) -> (i32, i32) {
    %c0_i32 = arith.constant 0 : i32
    %c0_i32_0 = arith.constant 0 : i32
    return %arg0, %c0_i32 : i32, i32
  }
  func.func @transform_1(%arg0: i32) -> (i32, i32) {
    %c0_i32 = arith.constant 0 : i32
    %c0_i32_0 = arith.constant 0 : i32
    %c0_i32_1 = arith.constant 0 : i32
    return %c0_i32, %c0_i32_0 : i32, i32
  }
  func.func @transform_2(%arg0: i32) -> (i32, i32) {
    %c0_i32 = arith.constant 0 : i32
    %c0_i32_0 = arith.constant 0 : i32
    %c0_i32_1 = arith.constant 0 : i32
    return %c0_i32, %c0_i32_0 : i32, i32
  }
  func.func @transform_3(%arg0: i32) -> (i32, i32) {
    %c0_i32 = arith.constant 0 : i32
    %c0_i32_0 = arith.constant 0 : i32
    %c0_i32_1 = arith.constant 0 : i32
    return %c0_i32, %c0_i32_0 : i32, i32
  }
  func.func @transform_4(%arg0: i32) -> (i32, i32) {
    %c0_i32 = arith.constant 0 : i32
    %c0_i32_0 = arith.constant 0 : i32
    %c0_i32_1 = arith.constant 0 : i32
    return %c0_i32, %c0_i32_0 : i32, i32
  }
  func.func @transform_5(%arg0: i32) -> (i32, i32) {
    %c0_i32 = arith.constant 0 : i32
    %c0_i32_0 = arith.constant 0 : i32
    %c0_i32_1 = arith.constant 0 : i32
    return %c0_i32, %c0_i32_0 : i32, i32
  }
  func.func @transform_6(%arg0: i32) -> (i32, i32) {
    %c0_i32 = arith.constant 0 : i32
    %c0_i32_0 = arith.constant 0 : i32
    %c0_i32_1 = arith.constant 0 : i32
    return %c0_i32, %c0_i32_0 : i32, i32
  }
  func.func @transform_7(%arg0: i32) -> (i32, i32) {
    %c0_i32 = arith.constant 0 : i32
    %c0_i32_0 = arith.constant 0 : i32
    %c0_i32_1 = arith.constant 0 : i32
    return %c0_i32, %c0_i32_0 : i32, i32
  }
  func.func @transform_8(%arg0: i32) -> (i32, i32) {
    %c0_i32 = arith.constant 0 : i32
    %c0_i32_0 = arith.constant 0 : i32
    %c0_i32_1 = arith.constant 0 : i32
    return %c0_i32, %c0_i32_0 : i32, i32
  }
  func.func @transform_9(%arg0: i32) -> (i32, i32) {
    %c0_i32 = arith.constant 0 : i32
    %c0_i32_0 = arith.constant 0 : i32
    %c0_i32_1 = arith.constant 0 : i32
    return %c0_i32, %c0_i32_0 : i32, i32
  }
  func.func @transform_10(%arg0: i32) -> (i32, i32) {
    %c0_i32 = arith.constant 0 : i32
    %c0_i32_0 = arith.constant 0 : i32
    %c0_i32_1 = arith.constant 0 : i32
    return %c0_i32, %c0_i32_0 : i32, i32
  }
  func.func @transform_11(%arg0: i32) -> (i32, i32) {
    %c0_i32 = arith.constant 0 : i32
    %c0_i32_0 = arith.constant 0 : i32
    return %arg0, %c0_i32 : i32, i32
  }
}

</mosaic_0001>

<bundles_post_ra>
// kernel: tpu_custom_call.1
= control target key start
LH: loop header
LB: loop body
LE: loop exit
PB: predicated region body
PF: predicated region fallthrough
CT: control target
= control target key end

     0   :  { %16 = vsyncpa [#allocation3], 0  ;;  %s1129_s0 = inlined_call_operand.hbm [shape: f32[8,32], index: 0, kind: input, shape index: {}]   ;;  %s1130_s1 = inlined_call_operand.hbm [shape: bf16[32,256], index: 1, kind: input, shape index: {}]   ;;  %s1131_s2 = inlined_call_operand.vmem [shape: f32[1,256], index: 2, kind: input, shape index: {}]   ;;  %s1132_s3 = inlined_call_operand.hbm [shape: bf16[256,128], index: 3, kind: input, shape index: {}]   ;;  %s1133_s4 = inlined_call_operand.vmem [shape: f32[1,128], index: 4, kind: input, shape index: {}]   ;;  %s1134_s5 = inlined_call_operand.vmem [shape: bf16[128,128], index: 5, kind: input, shape index: {}]   ;;  %s1135_s6 = inlined_call_operand.vmem [shape: f32[1,128], index: 6, kind: input, shape index: {}]   ;;  %s1136_s7 = inlined_call_operand.hbm [shape: bf16[128,128], index: 7, kind: input, shape index: {}]   ;;  %s1137_s8 = inlined_call_operand.vmem [shape: f32[1,128], index: 8, kind: input, shape index: {}]   ;;  %s1138_s9 = inlined_call_operand.vmem [shape: bf16[128,8], index: 9, kind: input, shape index: {}]   ;;  %s1139_s10 = inlined_call_operand.vmem [shape: f32[1,8], index: 10, kind: input, shape index: {}]   ;;  %s1140_s11 = inlined_call_operand.hbm [shape: f32[8,8], index: 11, kind: output, shape index: {}]  }
   0x1   :  { %17 = vsyncpa [#allocation6], 0 }
   0x2   :  { %18 = vsyncpa [#allocation9], 0  ;;  %s35_s19 = sshll.u32 %s1130_s1, 4  ;;  %s36_s19 = int_to_ptr.hbm [resolvable:$true] %s35_s19 }
   0x3   :  { %19 = vsyncpa [#allocation4], 0  ;;  %s982_s20 = smov [#allocation5]   ;;  %s25_s24 = sshll.u32 %s1129_s0, 4  ;;  %s26_s24 = int_to_ptr.hbm [resolvable:$true] %s25_s24 }
   0x4   :  { %s37_s21 = sshll.u32 %s982_s20, 4  ;;  %s983_s25 = smov 128   ;;  %s38_s21 = int_to_ptr.vmem [resolvable:$true] %s37_s21 }
   0x5   :  { %s984_s26 = smov 8   ;;  %s985_s27 = smov [#allocation2]  }
   0x6   :  { %43 = dma.hbm_to_vmem [thread:$0]  %s36_s19, 512, %s38_s21, [#allocation6], %s983_s25, %s983_s25, %s984_s26  }
   0x7   :  { %s27_s28 = sshll.u32 %s985_s27, 4  ;;  %s50_s12 = sshll.u32 %s1132_s3, 4  ;;  %s28_s28 = int_to_ptr.vmem [resolvable:$true] %s27_s28  ;;  %s51_s12 = int_to_ptr.hbm [resolvable:$true] %s50_s12 }
   0x8   :  { %30 = dma.hbm_to_vmem [thread:$0]  %s26_s24, 128, %s28_s28, [#allocation3]  }
   0x9   :  { %s986_s1 = smov [#allocation7]   ;;  %s69_s0 = sshll.u32 %s1136_s7, 4  ;;  %s70_s0 = int_to_ptr.hbm [resolvable:$true] %s69_s0 }
   0xa   :  { %s52_s13 = sshll.u32 %s986_s1, 4  ;;  %s987_s16 = smov 64   ;;  %s53_s13 = int_to_ptr.vmem [resolvable:$true] %s52_s13 }
   0xb   :  { %s988_s17 = smov 4   ;;  %s989_s18 = smov [#allocation8]  }
   0xc   :  { %58 = dma.hbm_to_vmem [thread:$0]  %s51_s12, 2048, %s53_s13, [#allocation6], %s987_s16, %s987_s16, %s988_s17  }
   0xd   :  { %s71_s19 = sshll.u32 %s989_s18, 4  ;;  %s72_s19 = int_to_ptr.vmem [resolvable:$true] %s71_s19 }
   0xe   :  { %77 = dma.hbm_to_vmem [thread:$0]  %s70_s0, 1024, %s72_s19, [#allocation9], %s987_s16, %s987_s16, %s988_s17  }
   0xf   :  { %974 = dma.done.wait [#allocation3], 128  }
  0x10   :  { %975 = vsyncadd [#allocation3], 4294967168 }
  0x11   :  { %976 = dma.done.wait [#allocation6], 2560  }
  0x12   :  { %977 = vsyncadd [#allocation6], 4294964736 }
  0x13   :  { %978 = dma.done.wait [#allocation9], 1024  }
  0x14   :  { %979 = vsyncadd [#allocation9], 4294966272  ;;  %v624_v0 = vld [vmem:[#allocation5 + $0x10] sm:$0xf]  ;;  %v796_v1 = vld [vmem:[#allocation5 + $0x14] sm:$0xf0] }
  0x15   :  { %v795_v2 = vld [vmem:[#allocation5 + $0x14] sm:$0xf]  ;;  %v625_v3 = vor.u32 %v796_v1, %v624_v0  ;;  %v626_v4 = vld [vmem:[#allocation5 + $0x18] sm:$0xf0]  ;;  %v616_v5 = vld [vmem:[#allocation5] sm:$0xf] }
  0x16   :  { %v794_v6 = vld [vmem:[#allocation5 + $0x4] sm:$0xf0]  ;;  %v629_v7 = vor.u32 %v795_v2, %v626_v4  ;;  %v793_v8 = vld [vmem:[#allocation5 + $0x4] sm:$0xf]  ;;  %v618_v9 = vld [vmem:[#allocation5 + $0x8] sm:$0xf0] }
  0x17   :  { %143 = vmatpush.bf16.msra.mxu0 %v625_v3  ;;  %v617_v10 = vor.u32 %v794_v6, %v616_v5  ;;  %v101_v11 = vld [vmem:[#allocation2] sm:$0xff]  ;;  %v621_v14 = vor.u32 %v793_v8, %v618_v9  ;;  %v803_v15 = vld [vmem:[#allocation7 + $0x30] sm:$0xff]  ;;  %vm133_vm0 = vcmask 261120   ;;  %v802_v18 = vld [vmem:[#allocation7 + $0x28] sm:$0xff]  ;;  %vm593_vm4 = vcmask 64512  }
  0x18   :  { %v804_v12 = vld [vmem:[#allocation7 + $0x38] sm:$0xff]  ;;  %156 = vmatpush.bf16.msra.mxu1 %v629_v7  ;;  %v811_v16 = vld [vmem:[#allocation7 + $0x70] sm:$0xff]  ;;  %v102_v17 = vpack.c.bf16 %v101_v11, %v101_v11  ;;  %v810_v19 = vld [vmem:[#allocation7 + $0x68] sm:$0xff] }
  0x19   :  { %v812_v13 = vld [vmem:[#allocation7 + $0x78] sm:$0xff]  ;;  %299 = vmatpush.bf16.msra.mxu2 %v804_v12  ;;  %v801_v20 = vld [vmem:[#allocation7 + $0x20] sm:$0xff]  ;;  %v799_v24 = vld [vmem:[#allocation7 + $0x10] sm:$0xff] }
  0x1a   :  { %312 = vmatpush.bf16.msra.mxu3 %v812_v13  ;;  %v809_v21 = vld [vmem:[#allocation7 + $0x60] sm:$0xff]  ;;  %v800_v22 = vld [vmem:[#allocation7 + $0x18] sm:$0xff]  ;;  %v807_v25 = vld [vmem:[#allocation7 + $0x50] sm:$0xff] }
  0x1b   :  { %144 = vmatpush.bf16.msra.mxu0 %v617_v10  ;;  %v808_v23 = vld [vmem:[#allocation7 + $0x58] sm:$0xff]  ;;  %v798_v26 = vld [vmem:[#allocation7 + $0x8] sm:$0xff]  ;;  %v797_v28 = vld [vmem:[#allocation7] sm:$0xff] }
  0x1c   :  { %157 = vmatpush.bf16.msra.mxu1 %v621_v14  ;;  %v806_v27 = vld [vmem:[#allocation7 + $0x48] sm:$0xff]  ;;  %v805_v29 = vld [vmem:[#allocation7 + $0x40] sm:$0xff]  ;;  %v820_v30 = vld [vmem:[%s1134_s5 + $0x38] sm:$0xff] }
  0x1d   :  { %300 = vmatpush.bf16.msra.mxu2 %v803_v15  ;;  %v819_v31 = vld [vmem:[%s1134_s5 + $0x30] sm:$0xff]  ;;  %v818_v32 = vld [vmem:[%s1134_s5 + $0x28] sm:$0xff]  ;;  %v817_v33 = vld [vmem:[%s1134_s5 + $0x20] sm:$0xff] }
  0x1e   :  { %313 = vmatpush.bf16.msra.mxu3 %v811_v16  ;;  %630 = vmatmul.msk.bf16.vlgmr.msra.gmra.mxu0 %vm133_vm0, %v102_v17  ;;  %v816_v34 = vld [vmem:[%s1134_s5 + $0x18] sm:$0xff]  ;;  %v107_v35 = vld [vmem:[%s1131_s2] sm:$0x3]  ;;  %v815_v36 = vld [vmem:[%s1134_s5 + $0x10] sm:$0xff] }
  0x1f   :  { %631 = vmatmul.msk.bf16.vlgmr.msra.gmra.mxu1 %vm133_vm0, %v102_v17  ;;  %395 = vmatpush.bf16.msrb.mxu0 %v820_v30  ;;  %v109_v37 = vperm.slane %v107_v35, 0  ;;  %v110_v38 = vperm.slane %v107_v35, 1  ;;  %v814_v49 = vld [vmem:[%s1134_s5 + $0x8] sm:$0xff]  ;;  %v813_v50 = vld [vmem:[%s1134_s5] sm:$0xff]  ;;  %v827_v52 = vld [vmem:[#allocation8 + $0x30] sm:$0xff] }
  0x20   :  { %v828_v51 = vld [vmem:[#allocation8 + $0x38] sm:$0xff]  ;;  %v826_v53 = vld [vmem:[#allocation8 + $0x28] sm:$0xff]  ;;  %v825_v54 = vld [vmem:[#allocation8 + $0x20] sm:$0xff] }
  0x21   :  { %301 = vmatpush.bf16.msra.mxu2 %v802_v18  ;;  %478 = vmatpush.bf16.msrb.mxu1 %v828_v51  ;;  %v824_v55 = vld [vmem:[#allocation8 + $0x18] sm:$0xff]  ;;  %v823_v56 = vld [vmem:[#allocation8 + $0x10] sm:$0xff]  ;;  %v822_v2 = vld [vmem:[#allocation8 + $0x8] sm:$0xff] }
  0x22   :  { %314 = vmatpush.bf16.msra.mxu3 %v810_v19  ;;  %v846_v57 = vld [vmem:[%s1133_s4] ss:$0 sm:$0xff]  ;;  %v821_v3 = vld [vmem:[#allocation8] sm:$0xff]  ;;  %v836_v4 = vld [vmem:[%s1138_s9 + $0x38] sm:$0xff] }
  0x23   :  { %396 = vmatpush.bf16.msrb.mxu0 %v819_v31  ;;  %v835_v5 = vld [vmem:[%s1138_s9 + $0x30] sm:$0xff]  ;;  %v834_v6 = vld [vmem:[%s1138_s9 + $0x28] sm:$0xff]  ;;  %v833_v7 = vld [vmem:[%s1138_s9 + $0x20] sm:$0xff] }
  0x24   :  { %v832_v8 = vld [vmem:[%s1138_s9 + $0x18] sm:$0xff]  ;;  %v831_v9 = vld [vmem:[%s1138_s9 + $0x10] sm:$0xff]  ;;  %v847_v10 = vld [vmem:[%s1135_s6] ss:$0 sm:$0xff] }
  0x25   :  { %302 = vmatpush.bf16.msra.mxu2 %v801_v20  ;;  %479 = vmatpush.bf16.msrb.mxu1 %v827_v52  ;;  %v830_v16 = vld [vmem:[%s1138_s9 + $0x8] sm:$0xff]  ;;  %v829_v17 = vld [vmem:[%s1138_s9] sm:$0xff] }
  0x26   :  { %315 = vmatpush.bf16.msra.mxu3 %v809_v21  ;;  %v848_v18 = vld [vmem:[%s1137_s8] ss:$0 sm:$0xff]  ;;  %s990_s8 = smov [#allocation10]  }
  0x27   :  { %397 = vmatpush.bf16.msrb.mxu0 %v818_v32  ;;  %s600_s9 = sshll.u32 %s990_s8, 4  ;;  %s601_s9 = int_to_ptr.vmem [resolvable:$true] %s600_s9 }
  0x29   :  { %303 = vmatpush.bf16.msra.mxu2 %v800_v22  ;;  %480 = vmatpush.bf16.msrb.mxu1 %v826_v53 }
  0x2a   :  { %316 = vmatpush.bf16.msra.mxu3 %v808_v23 }
  0x2b   :  { %398 = vmatpush.bf16.msrb.mxu0 %v817_v33 }
  0x2d   :  { %304 = vmatpush.bf16.msra.mxu2 %v799_v24  ;;  %481 = vmatpush.bf16.msrb.mxu1 %v825_v54  ;;  %v849_v24 = vld [vmem:[%s1139_s10] ss:$0 sm:$0xff]  ;;  %s602_s10 = sshll.u32 %s1140_s11, 4  ;;  %s603_s10 = int_to_ptr.hbm [resolvable:$true] %s602_s10 }
  0x2e   :  { %317 = vmatpush.bf16.msra.mxu3 %v807_v25 }
  0x2f   :  { %399 = vmatpush.bf16.msrb.mxu0 %v816_v34 }
  0x31   :  { %305 = vmatpush.bf16.msra.mxu2 %v798_v26  ;;  %482 = vmatpush.bf16.msrb.mxu1 %v824_v55 }
  0x32   :  { %318 = vmatpush.bf16.msra.mxu3 %v806_v27 }
  0x33   :  { %400 = vmatpush.bf16.msrb.mxu0 %v815_v36 }
  0x35   :  { %306 = vmatpush.bf16.msra.mxu2 %v797_v28  ;;  %483 = vmatpush.bf16.msrb.mxu1 %v823_v56 }
  0x36   :  { %319 = vmatpush.bf16.msra.mxu3 %v805_v29 }
  0x37   :  { %401 = vmatpush.bf16.msrb.mxu0 %v814_v49 }
  0x39   :  { %484 = vmatpush.bf16.msrb.mxu1 %v822_v2  ;;  %561 = vmatpush.bf16.msrb.mxu2 %v836_v4 }
  0x3b   :  { %402 = vmatpush.bf16.msrb.mxu0 %v813_v50 }
  0x3d   :  { %485 = vmatpush.bf16.msrb.mxu1 %v821_v3  ;;  %562 = vmatpush.bf16.msrb.mxu2 %v835_v5 }
  0x41   :  { %563 = vmatpush.bf16.msrb.mxu2 %v834_v6 }
  0x45   :  { %564 = vmatpush.bf16.msrb.mxu2 %v833_v7 }
  0x49   :  { %565 = vmatpush.bf16.msrb.mxu2 %v832_v8 }
  0x4d   :  { %566 = vmatpush.bf16.msrb.mxu2 %v831_v9 }
  0x51   :  { %567 = vmatpush.bf16.msrb.mxu2 %v830_v16 }
  0x55   :  { %568 = vmatpush.bf16.msrb.mxu2 %v829_v17 }
  0x9b   :  { %v146_v39 = vpop.f32.mrf.mxu0 }
  0x9c   :  { %v147_v40 = vadd.f32 %v146_v39, %v109_v37  ;;  %v159_v41 = vpop.f32.mrf.mxu1 }
  0x9d   :  { %v160_v42 = vadd.f32 %v159_v41, %v110_v38 }
  0x9e   :  { %v163_v43 = vmax.f32 %v147_v40, 0.0 }
  0x9f   :  { %v164_v44 = vmax.f32 %v160_v42, 0.0 }
  0xa0   :  { %v165_v45 = vpack.c.bf16 %v163_v43, %v163_v43 }
  0xa1   :  { %v166_v46 = vpack.c.bf16 %v164_v44, %v164_v44 }
  0xa2   :  { %307 = vmatmul.bf16.vlgmr.msra.gmra.mxu2 %v165_v45 }
  0xa3   :  { %320 = vmatmul.bf16.vlgmr.msra.gmra.mxu3 %v166_v46  ;;  %v148_v47 = vpop.f32.mrf.mxu0 }
  0xa4   :  { %v161_v48 = vpop.f32.mrf.mxu1 }
 0x125   :  { %v308_v58 = vpop.f32.mrf.mxu2 }
 0x126   :  { %v309_v59 = vadd.f32 %v846_v57, %v308_v58  ;;  %v321_v60 = vpop.f32.mrf.mxu3 }
 0x128   :  { %v322_v61 = vadd.f32 %v321_v60, %v309_v59 }
 0x12a   :  { %v325_v62 = vmax.f32 %v322_v61, 0.0 }
 0x12c   :  { %v326_v63 = vpack.c.bf16 %v325_v62, %v325_v62 }
 0x12d   :  { %v310_v0 = vpop.f32.mrf.mxu2 }
 0x12e   :  { %v323_v1 = vpop.f32.mrf.mxu3  ;;  %403 = vmatmul.bf16.vlgmr.msrb.gmra.mxu0 %v326_v63 }
 0x1ab   :  { %v404_v11 = vpop.f32.mrf.mxu0 }
 0x1ac   :  { %v405_v12 = vadd.f32 %v847_v10, %v404_v11 }
 0x1ae   :  { %v408_v13 = vmax.f32 %v405_v12, 0.0 }
 0x1b0   :  { %v409_v14 = vpack.c.bf16 %v408_v13, %v408_v13 }
 0x1b2   :  { %486 = vmatmul.bf16.vlgmr.msrb.gmra.mxu1 %v409_v14 }
 0x1b3   :  { %v406_v15 = vpop.f32.mrf.mxu0 }
 0x22f   :  { %v487_v19 = vpop.f32.mrf.mxu1 }
 0x230   :  { %v488_v20 = vadd.f32 %v848_v18, %v487_v19 }
 0x232   :  { %v491_v21 = vmax.f32 %v488_v20, 0.0 }
 0x234   :  { %v492_v22 = vpack.c.bf16 %v491_v21, %v491_v21 }
 0x236   :  { %569 = vmatmul.bf16.vlgmr.msrb.gmra.mxu2 %v492_v22 }
 0x237   :  { %v489_v23 = vpop.f32.mrf.mxu1 }
 0x2b9   :  { %v570_v25 = vpop.f32.mrf.mxu2 }
 0x2ba   :  { %v571_v26 = vadd.f32 %v849_v24, %v570_v25 }
 0x2bc   :  { %v792_v27 = vmul.f32 -1.442695, %v571_v26 }
 0x2be   :  { %850 = vpow2.f32 %v792_v27 }
 0x2c1   :  { %v572_v28 = vpop.f32.mrf.mxu2 }
 0x2c4   :  { %v851_v29 = vpop.eup %850 }
 0x2c5   :  { %v577_v30 = vadd.f32 1.0, %v851_v29 }
 0x2c7   :  { %852 = vrcp.f32 %v577_v30  ;;  %v589_v34 = vand.u32 2147483648, %v577_v30  ;;  %v587_v36 = vand.u32 2147483647, %v577_v30  ;;  %vm583_vm2 = vweird.f32 %v577_v30 }
 0x2c9   :  { %v590_v38 = vor.u32 1.1754944e-38, %v589_v34  ;;  %vm588_vm5 = vcmp.eq.f32.partialorder %v587_v36, 8.507059e+37 }
 0x2cd   :  { %v853_v31 = vpop.eup %852 }
 0x2ce   :  { %v579_v32 = vmul.f32 %v853_v31, %v577_v30  ;;  %vm584_vm1 = vweird.f32 %v853_v31 }
 0x2cf   :  { %vm585_vm3 = vmor %vm583_vm2, %vm584_vm1 }
 0x2d0   :  { %v580_v33 = vsub.f32 1.0, %v579_v32 }
 0x2d2   :  { %v581_v35 = vmul.f32 %v853_v31, %v580_v33 }
 0x2d4   :  { %v582_v37 = vadd.f32 %v853_v31, %v581_v35 }
 0x2d6   :  { %v586_v39 = vsel %vm585_vm3, %v853_v31, %v582_v37 }
 0x2d7   :  { %v591_v40 = vsel %vm588_vm5, %v590_v38, %v586_v39 }
 0x2d8   :  { %594 = vst.msk [vmem:[#allocation10] sm:$0xff] %vm593_vm4, %v591_v40 }
 0x2d9   :  { %605 = dma.vmem_to_hbm [thread:$0]  %s601_s9, 128, %s603_s10, [#allocation4]  }
 0x2da   :  { %980 = dma.done.wait [#allocation4], 128  }
 0x2db   :  { %981 = vsyncadd [#allocation4], 4294967168 }
 0x2dc   :  { %610 = vsyncpa [#allocation3], 1 }
 0x2dd   :  { %611 = vsyncpa [#allocation6], 1 }
 0x2de   :  { %612 = vsyncpa [#allocation9], 1 }
 0x2df   :  { %613 = vsyncpa [#allocation4], 1 }

</bundles_post_ra>
